<compile_context>
chip_gen: v6e
topology: v6e:2x2x1
jax: 0.10.0
libtpu: 0.0.40
codegen_flags: <defaults>
</compile_context>

<pallas_src>
import functools

import jax
import jax.numpy as jnp
from jax import lax
from jax.experimental import pallas as pl
from jax.experimental.pallas import tpu as pltpu


def _sdpa_kernel(q_ref, k_ref, v_ref, out_ref, attn_ref=None, *,
                 inv_temperature):
    # One grid step: q slab (bb, bq, D), full k/v for those batches.
    q = q_ref[...]                                               # (bb, bq, D)
    k = k_ref[...]                                               # (bb, Lk, D)
    v = v_ref[...]                                               # (bb, Lk, Dv)

    # Scores: contract q dim 2 with k dim 2, batch dim 0. k is consumed in its
    # stored layout (no transpose); MXU accumulates in f32 even for bf16 ops.
    s = lax.dot_general(
        q, k,
        dimension_numbers=(((2,), (2,)), ((0,), (0,))),
        preferred_element_type=jnp.float32)                      # (bb, bq, Lk)

    # Numerically-stable softmax of (s / temperature), done in f32.
    # temperature > 0, so softmax(s/t) == exp((s - max(s)) / t) / sum(...):
    # the scale is applied once to the f32 exp argument (bf16-input parity
    # with torch, which scales the f32 scores).
    m = jnp.max(s, axis=-1, keepdims=True)
    p = jnp.exp((s - m) * inv_temperature)
    denom = jnp.sum(p, axis=-1, keepdims=True)
    # Exact reciprocal on the tiny (bb, bq, 1) denominator: stored attn rows
    # sum to 1 (matches torch.softmax much more closely than approx=True).
    attn_lp = (p * (1.0 / denom)).astype(v.dtype)                # (bb, bq, Lk)

    if attn_ref is not None:
        attn_ref[...] = attn_lp.astype(attn_ref.dtype)

    # Output: attn @ v, matmul operands in v's dtype, f32 MXU accumulation.
    out = lax.dot_general(
        attn_lp, v,
        dimension_numbers=(((2,), (1,)), ((0,), (0,))),
        preferred_element_type=jnp.float32)                      # (bb, bq, Dv)
    out_ref[...] = out.astype(out_ref.dtype)


def _divisors_desc(n):
    return [d for d in range(n, 0, -1) if n % d == 0]


def _vmem_budgets():
    """Derive (per-step block budget, scoped vmem limit) from the chip."""
    cap = 64 * 1024 * 1024  # conservative default: v7x physical VMEM
    try:
        info = pltpu.get_tpu_info()
        cap = int(getattr(info, "vmem_capacity_bytes", cap))
    except Exception:
        pass
    # v5e/v6e (128 MiB) -> 96 MiB scoped limit; v7x (64 MiB) -> 48 MiB.
    vmem_limit = min(int(cap * 0.75), 100 * 1024 * 1024)
    # Leave headroom for Mosaic internal scratch and layout padding.
    block_budget = vmem_limit // 2
    return block_budget, vmem_limit


def _choose_blocks(B, Lq, Lk, D, Dv, in_itemsize, attn_itemsize, budget_bytes,
                   return_attn, want_batch_steps):
    """Pick (block_b, block_q) so the double-buffered per-step working set
    stays under `budget_bytes`, preferring tilings that keep >= 2 batch-grid
    steps (so v7x's two TensorCores both get work)."""
    # dtype-aware sublane alignment: f32 -> 8 rows, bf16 -> 16, int8/fp8 -> 32.
    sub = max(8, 32 // max(1, in_itemsize))
    bq_cands = [Lq] + [d for d in _divisors_desc(Lq) if d != Lq and d % sub == 0]
    bb_cands = _divisors_desc(B)

    def working_set(bb, bq):
        qb = bb * bq * D * in_itemsize
        kb = bb * Lk * D * in_itemsize
        vb = bb * Lk * Dv * in_itemsize
        ob = bb * bq * Dv * in_itemsize
        ab = bb * bq * Lk * attn_itemsize if return_attn else 0
        f32_tmp = bb * bq * Lk * 4 * 2          # s and p live in f32
        # x2: BlockSpec double-buffers every pipelined operand.
        return 2 * (qb + kb + vb + ob + ab) + f32_tmp

    best_fit = None
    for bq in bq_cands:
        for bb in bb_cands:
            if working_set(bb, bq) <= budget_bytes:
                if best_fit is None:
                    best_fit = (bb, bq)
                if (B // bb) >= want_batch_steps:
                    return bb, bq
    if best_fit is not None:
        return best_fit
    # TODO(synk): nothing fits when Lk*(D+Dv) alone exceeds the budget; an
    # Lk-tiled two-pass softmax would be required for graceful degradation.
    return 1, bq_cands[-1]


def scaled_dot_product_attention(q, k, v, temperature, *, return_attn=True):
    """Pallas implementation of ScaledDotProductAttention.forward (eval mode).

    Returns (output, attn) when return_attn=True (matches the PyTorch module),
    or just output when return_attn=False (skips the attn HBM writeback).
    """
    B, Lq, D = q.shape
    Bk, Lk, Dk = k.shape
    Bv, Lv, Dv = v.shape
    assert B == Bk == Bv and D == Dk and Lk == Lv
    assert float(temperature) > 0.0

    in_itemsize = jnp.dtype(q.dtype).itemsize
    attn_dtype = q.dtype  # attn inherits the input dtype (as in torch)
    attn_itemsize = jnp.dtype(attn_dtype).itemsize

    block_budget, vmem_limit = _vmem_budgets()
    want_batch_steps = 2 if B >= 2 else 1
    bb, bq = _choose_blocks(B, Lq, Lk, D, Dv, in_itemsize, attn_itemsize,
                            block_budget, return_attn, want_batch_steps)

    grid = (B // bb, Lq // bq)

    kernel = functools.partial(
        _sdpa_kernel, inv_temperature=1.0 / float(temperature))

    out_shapes = [jax.ShapeDtypeStruct((B, Lq, Dv), q.dtype)]
    out_specs = [pl.BlockSpec((bb, bq, Dv), lambda bi, qi: (bi, qi, 0))]
    bytes_accessed = (B * Lq * D + B * Lk * D + B * Lk * Dv
                      + B * Lq * Dv) * in_itemsize
    if return_attn:
        out_shapes.append(jax.ShapeDtypeStruct((B, Lq, Lk), attn_dtype))
        out_specs.append(pl.BlockSpec((bb, bq, Lk), lambda bi, qi: (bi, qi, 0)))
        bytes_accessed += B * Lq * Lk * attn_itemsize

    grid_spec = pltpu.PrefetchScalarGridSpec(
        num_scalar_prefetch=0,
        grid=grid,
        in_specs=[
            pl.BlockSpec((bb, bq, D), lambda bi, qi: (bi, qi, 0)),
            pl.BlockSpec((bb, Lk, D), lambda bi, qi: (bi, 0, 0)),
            pl.BlockSpec((bb, Lk, Dv), lambda bi, qi: (bi, 0, 0)),
        ],
        out_specs=out_specs,
    )

    results = pl.pallas_call(
        kernel,
        out_shape=tuple(out_shapes),
        grid_spec=grid_spec,
        compiler_params=pltpu.CompilerParams(
            # Batch axis parallel (megacore shards it; each core keeps its own
            # k/v slab resident across query tiles); query axis arbitrary.
            dimension_semantics=("parallel", "arbitrary"),
            vmem_limit_bytes=vmem_limit),
        cost_estimate=pl.CostEstimate(
            flops=2 * B * Lq * Lk * (D + Dv),
            transcendentals=B * Lq * Lk,
            bytes_accessed=bytes_accessed),
    )(q, k, v)

    if return_attn:
        return results[0], results[1]
    return results[0]


if __name__ == "__main__":
    # Small shapes consistent with the module's bmm-based forward.
    B, Lq, Lk, D, Dv = 2, 8, 8, 16, 16
    temperature = float(D) ** 0.5  # typical choice: sqrt(d_k)

    key = jax.random.PRNGKey(0)
    kq, kk, kv = jax.random.split(key, 3)
    q = jax.random.normal(kq, (B, Lq, D), dtype=jnp.float32)
    k = jax.random.normal(kk, (B, Lk, D), dtype=jnp.float32)
    v = jax.random.normal(kv, (B, Lk, Dv), dtype=jnp.float32)

    # Module semantics: returns (output, attn).
    out, attn = scaled_dot_product_attention(q, k, v, temperature)
    jax.block_until_ready((out, attn))

    # Output-only fast path (skips the attn HBM writeback).
    out_only = scaled_dot_product_attention(q, k, v, temperature,
                                            return_attn=False)
    jax.block_until_ready(out_only)

    # Sanity check against a plain-JAX reference of the same math.
    s_ref = jnp.einsum("bqd,bkd->bqk", q, k) / temperature
    attn_ref = jax.nn.softmax(s_ref, axis=2)
    out_ref = jnp.einsum("bqk,bkd->bqd", attn_ref, v)
    assert jnp.allclose(attn, attn_ref, atol=2e-3, rtol=2e-3)
    assert jnp.allclose(out, out_ref, atol=2e-3, rtol=2e-3)
    assert jnp.allclose(out_only, out, atol=1e-6, rtol=1e-6)

    print("KERNEL_OK")
</pallas_src>

<mosaic_0001>
module attributes {stable_mosaic.version = 11 : i64} {
  func.func @_sdpa_kernel(%arg0: i32, %arg1: i32, %arg2: memref<1x8x16xf32, #tpu.memory_space<vmem>>, %arg3: memref<1x8x16xf32, #tpu.memory_space<vmem>>, %arg4: memref<1x8x16xf32, #tpu.memory_space<vmem>>, %arg5: memref<1x8x16xf32, #tpu.memory_space<vmem>>, %arg6: memref<1x8x8xf32, #tpu.memory_space<vmem>>) attributes {dimension_semantics = [#tpu.dimension_semantics<parallel>, #tpu.dimension_semantics<arbitrary>], iteration_bounds = array<i64: 2, 1>, scalar_prefetch = 0 : i64, scratch_operands = 0 : i64, tpu.core_type = #tpu.core_type<tc>, window_params = [{transform_indices = @transform_0, window_bounds = array<i64: 1, 8, 16>}, {transform_indices = @transform_1, window_bounds = array<i64: 1, 8, 16>}, {transform_indices = @transform_2, window_bounds = array<i64: 1, 8, 16>}, {transform_indices = @transform_3, window_bounds = array<i64: 1, 8, 16>}, {transform_indices = @transform_4, window_bounds = array<i64: 1, 8, 8>}]} {
    %c0 = arith.constant 0 : index
    %c0_0 = arith.constant 0 : index
    %c0_1 = arith.constant 0 : index
    %0 = vector.load %arg2[%c0, %c0_0, %c0_1] : memref<1x8x16xf32, #tpu.memory_space<vmem>>, vector<1x8x16xf32>
    %c0_2 = arith.constant 0 : index
    %c0_3 = arith.constant 0 : index
    %c0_4 = arith.constant 0 : index
    %1 = vector.load %arg3[%c0_2, %c0_3, %c0_4] : memref<1x8x16xf32, #tpu.memory_space<vmem>>, vector<1x8x16xf32>
    %c0_5 = arith.constant 0 : index
    %c0_6 = arith.constant 0 : index
    %c0_7 = arith.constant 0 : index
    %2 = vector.load %arg4[%c0_5, %c0_6, %c0_7] : memref<1x8x16xf32, #tpu.memory_space<vmem>>, vector<1x8x16xf32>
    %cst = arith.constant dense<0.000000e+00> : vector<1x8x8xf32>
    %3 = tpu.matmul %0, %1, %cst {dimension_numbers = #tpu.dot_dimension_numbers<[2], [2], [1], [1], [0, 0, 0, 1, 1, 1], [0], [0]>} : vector<1x8x16xf32>, vector<1x8x16xf32>, vector<1x8x8xf32> -> vector<1x8x8xf32>
    %cst_8 = arith.constant dense<0xFF800000> : vector<1x8xf32>
    %4 = vector.multi_reduction <maximumf>, %3, %cst_8 [2] : vector<1x8x8xf32> to vector<1x8xf32>
    %5 = vector.shape_cast %4 : vector<1x8xf32> to vector<1x8x1xf32>
    %6 = vector.broadcast %5 : vector<1x8x1xf32> to vector<1x8x8xf32>
    %7 = arith.subf %3, %6 : vector<1x8x8xf32>
    %cst_9 = arith.constant 2.500000e-01 : f32
    %8 = vector.broadcast %cst_9 : f32 to vector<1x8x8xf32>
    %9 = arith.mulf %7, %8 : vector<1x8x8xf32>
    %10 = math.exp %9 : vector<1x8x8xf32>
    %cst_10 = arith.constant dense<0.000000e+00> : vector<1x8xf32>
    %11 = vector.multi_reduction <add>, %10, %cst_10 [2] : vector<1x8x8xf32> to vector<1x8xf32>
    %12 = vector.shape_cast %11 : vector<1x8xf32> to vector<1x8x1xf32>
    %cst_11 = arith.constant 1.000000e+00 : f32
    %13 = vector.broadcast %cst_11 : f32 to vector<1x8x1xf32>
    %14 = arith.divf %13, %12 : vector<1x8x1xf32>
    %15 = vector.broadcast %14 : vector<1x8x1xf32> to vector<1x8x8xf32>
    %16 = arith.mulf %10, %15 : vector<1x8x8xf32>
    %c0_12 = arith.constant 0 : index
    %c0_13 = arith.constant 0 : index
    %c0_14 = arith.constant 0 : index
    %17 = vector.load %arg6[%c0_12, %c0_13, %c0_14] : memref<1x8x8xf32, #tpu.memory_space<vmem>>, vector<1x8x8xf32>
    tpu.vector_store %arg6[%c0_12, %c0_13, %c0_14], %16 {strides = array<i32>} : memref<1x8x8xf32, #tpu.memory_space<vmem>>, vector<1x8x8xf32>,
    %cst_15 = arith.constant dense<0.000000e+00> : vector<1x8x16xf32>
    %18 = tpu.matmul %16, %2, %cst_15 {dimension_numbers = #tpu.dot_dimension_numbers<[2], [1], [1], [2], [0, 0, 0, 1, 1, 2], [0], [0]>} : vector<1x8x8xf32>, vector<1x8x16xf32>, vector<1x8x16xf32> -> vector<1x8x16xf32>
    %c0_16 = arith.constant 0 : index
    %c0_17 = arith.constant 0 : index
    %c0_18 = arith.constant 0 : index
    %19 = vector.load %arg5[%c0_16, %c0_17, %c0_18] : memref<1x8x16xf32, #tpu.memory_space<vmem>>, vector<1x8x16xf32>
    tpu.vector_store %arg5[%c0_16, %c0_17, %c0_18], %18 {strides = array<i32>} : memref<1x8x16xf32, #tpu.memory_space<vmem>>, vector<1x8x16xf32>,
    return
  }
  func.func @transform_0(%arg0: i32, %arg1: i32) -> (i32, i32, i32) {
    %c0_i32 = arith.constant 0 : i32
    %c0_i32_0 = arith.constant 0 : i32
    return %arg0, %arg1, %c0_i32 : i32, i32, i32
  }
  func.func @transform_1(%arg0: i32, %arg1: i32) -> (i32, i32, i32) {
    %c0_i32 = arith.constant 0 : i32
    %c0_i32_0 = arith.constant 0 : i32
    %c0_i32_1 = arith.constant 0 : i32
    return %arg0, %c0_i32, %c0_i32_0 : i32, i32, i32
  }
  func.func @transform_2(%arg0: i32, %arg1: i32) -> (i32, i32, i32) {
    %c0_i32 = arith.constant 0 : i32
    %c0_i32_0 = arith.constant 0 : i32
    %c0_i32_1 = arith.constant 0 : i32
    return %arg0, %c0_i32, %c0_i32_0 : i32, i32, i32
  }
  func.func @transform_3(%arg0: i32, %arg1: i32) -> (i32, i32, i32) {
    %c0_i32 = arith.constant 0 : i32
    %c0_i32_0 = arith.constant 0 : i32
    return %arg0, %arg1, %c0_i32 : i32, i32, i32
  }
  func.func @transform_4(%arg0: i32, %arg1: i32) -> (i32, i32, i32) {
    %c0_i32 = arith.constant 0 : i32
    %c0_i32_0 = arith.constant 0 : i32
    return %arg0, %arg1, %c0_i32 : i32, i32, i32
  }
}

</mosaic_0001>

<bundles_post_ra>
// kernel: tpu_custom_call.1
= control target key start
LH: loop header
LB: loop body
LE: loop exit
PB: predicated region body
PF: predicated region fallthrough
CT: control target
= control target key end

     0   :  { %s1265_s0 = inlined_call_operand.hbm [shape: f32[2,8,16], index: 0, kind: input, shape index: {}]   ;;  %s1266_s1 = inlined_call_operand.hbm [shape: f32[2,8,16], index: 1, kind: input, shape index: {}]   ;;  %s1267_s2 = inlined_call_operand.hbm [shape: f32[2,8,16], index: 2, kind: input, shape index: {}]   ;;  %s1268_s3 = inlined_call_operand.hbm [shape: f32[2,8,16], index: 3, kind: output, shape index: {0}]   ;;  %s1269_s4 = inlined_call_operand.hbm [shape: f32[2,8,8], index: 4, kind: output, shape index: {1}]  }
   0x1   :  { %1273 = sst [smem:[#allocation18_spill]] %s1266_s1 }
   0x2   :  { %10 = vsyncpa [#allocation3], 0 }
   0x3   :  { %12 = vsyncpa [#allocation3 + $0x1], 0 }
   0x4   :  { %13 = vsyncpa [#allocation6], 0 }
   0x5   :  { %15 = vsyncpa [#allocation6 + $0x1], 0 }
   0x6   :  { %16 = vsyncpa [#allocation4], 0 }
   0x7   :  { %18 = vsyncpa [#allocation4 + $0x1], 0 }
   0x8   :  { %19 = vsyncpa [#allocation10], 0 }
   0x9   :  { %21 = vsyncpa [#allocation10 + $0x1], 0  ;;  %s1027_s15 = smov 0   ;;  %s1029_s16 = smov 0  }
   0xa   :  { %s1031_s17 = smov 0   ;;  %s1033_s18 = smov 0  }
   0xb   :  { %s1035_s19 = smov 0   ;;  %s1037_s20 = smov 0  }
   0xc LB: > { %1274 = sst [smem:[#allocation15_spill]] %s989_s19  ;;  %s1058_s21 = sadd.s32 4294967295, %s993_s20   ;;  %s993_s20 = sphi %s1037_s20, %s27_s20   ;;  %s989_s19 = sphi %s1035_s19, %s1288_s19   ;;  %s985_s18 = sphi %s1033_s18, %s1287_s18   ;;  %s981_s17 = sphi %s1031_s17, %s1291_s17   ;;  %s977_s16 = sphi %s1029_s16, %s1290_s16   ;;  %s973_s15 = sphi %s1027_s15, %s1289_s15  }
   0xd   : > { %s674_s22 = sadd.s32 4294967294, %s993_s20   ;;  %s39_s23 = sadd.s32 1, %s989_s19 }
   0xe   : > { %s48_s24 = sadd.s32 1, %s981_s17  ;;  %p41_p0 = scmp.ge.s32.totalorder %s39_s23, 2 }
   0xf   : > { %p55_p1 = scmp.ne.s32.totalorder %s981_s17, %s977_s16  ;;  %p56_p2 = scmp.eq.s32.totalorder %s993_s20, 0 }
  0x10   : > { %p61_p3 = scmp.ne.s32.totalorder %s977_s16, %s973_s15  ;;  %s1293_s23 = smov (%p41_p0, %s39_s23), 0 }
  0x11   : > { %1275 = sst [smem:[#allocation16_spill]] %s1293_s23  ;;  %p1070_p4 = por %p56_p2, %p55_p1 }
  0x12   : > { %p62_p5 = scmp.eq.s32.totalorder %s1058_s21, 0  ;;  %s43_s26 = ssub.s32 %s989_s19, %s1293_s23 }
  0x13   : > { %p139_p6 = scmp.eq.s32.totalorder %s1058_s21, 1  ;;  %p46_p7 = scmp.eq.s32.totalorder %s43_s26, 0 }
  0x14   : > { %p1078_p8 = por %p62_p5, %p61_p3  ;;  %p145_p10 = scmp.eq.s32.totalorder %s674_s22, 1 }
  0x15   : > { %p1082_p9 = por %p139_p6, %p55_p1  ;;  %p739_p13 = scmp.lt.s32.totalorder %s993_s20, 2 }
  0x16   : > { %s1087_s29 = scalar_select %p46_p7, %s981_s17, %s48_s24  }
  0x17   : > { %p1089_p11 = por %p145_p10, %p61_p3  ;;  %s1270_s5 = sand.u32 1, %s981_s17  }
  0x18   : > { %1279 = sst [smem:[#allocation17_spill]] %s1087_s29  ;;  %s1098_s6 = sshll.u32 %s1270_s5, 3 }
  0x19   : > { %s1101_s7 = sshll.u32 %s989_s19, 7  ;;  %p1105_p0 = pnand %p739_p13, %p1070_p4 }
  0x1a   : > { %s212_s9 = sand.u32 1, %s993_s20   ;;  %s1282_s1 = sld [smem:[#allocation18_spill]] }
  0x1b   : > { %s216_s13 = scalar_lea.vmem [#allocation5], %s1098_s6  ;;  %p683_p1 = scmp.ge.s32.totalorder %s993_s20, 1 }
  0x1c   : > { %s223_s14 = sshll.u32 %s216_s13, 4  ;;  %p246_p2 = scmp.lt.s32.totalorder %s993_s20, 3  ;;  %s224_s14 = int_to_ptr.vmem [resolvable:$true] %s223_s14 }
  0x1d   : > { %s1117_s22 = scalar_lea.sflag [#allocation6], %s212_s9  ;;  %p797_p3 = pneg %p1105_p0 }
  0x1e   : > { %s808_s24 = scalar_lea.vmem %s224_s14, 128  ;;  %s995_s25 = smov [#allocation5]  }
  0x1f   : > { %p809_p4 = scmp.ne.s32.totalorder %s224_s14, %s808_s24  ;;  %s813_s26 = sshll.u32 %s995_s25, 4  ;;  %s814_s26 = int_to_ptr.vmem [resolvable:$false] %s813_s26 }
  0x20   : > { %s221_s12 = scalar_lea.hbm %s1282_s1, %s1101_s7  ;;  %s815_s10 = scalar_lea.vmem %s814_s26, 256 }
  0x21   : > { %p811_p5 = pnand %p809_p4, %p797_p3  ;;  %p816_p7 = scmp.lt.s32.totalorder %s224_s14, %s814_s26 }
  0x22   : > { %p817_p10 = scmp.lt.s32.totalorder %s815_s10, %s808_s24 }
  0x23   : > { %p812_p6 = pneg %p811_p5 }
  0x24   : > { %p818_p13 = por %p817_p10, %p816_p7 }
  0x26   : > { %p819_p12 = pnand %p818_p13, %p812_p6 }
  0x28   : > { %822 = shalt.err (!%p819_p12)
}
  0x29   : > { %728 = dma.hbm_to_vmem [thread:$0]  (!%p1105_p0), %s221_s12, 128, %s224_s14, %s1117_s22  }
  0x2a   : > { %p1131_p4 = pnand %p683_p1, %p246_p2  ;;  %s203_s24 = scalar_lea.hbm %s1265_s0, %s1101_s7 }
  0x2b   : > { %s197_s25 = scalar_lea.vmem [#allocation2], %s1098_s6  ;;  %s239_s1 = scalar_lea.hbm %s1267_s2, %s1101_s7 }
  0x2c   : > { %s205_s26 = sshll.u32 %s197_s25, 4  ;;  %s1284_s23 = sand.u32 1, %s981_s17   ;;  %s206_s26 = int_to_ptr.vmem [resolvable:$true] %s205_s26 }
  0x2d   : > { %s194_s19 = scalar_lea.sflag [#allocation3], %s1284_s23  ;;  %s836_s12 = scalar_lea.vmem %s206_s26, 128 }
  0x2e   : > { %p837_p12 = scmp.ne.s32.totalorder %s206_s26, %s836_s12  ;;  %s996_s14 = smov [#allocation2]  }
  0x2f   : > { %s841_s29 = sshll.u32 %s996_s14, 4  ;;  %s842_s29 = int_to_ptr.vmem [resolvable:$false] %s841_s29 }
  0x30   : > { %p839_p1 = pnand %p837_p12, %p797_p3  ;;  %s843_s11 = scalar_lea.vmem %s842_s29, 256 }
  0x31   : > { %p844_p5 = scmp.lt.s32.totalorder %s206_s26, %s842_s29  ;;  %p845_p6 = scmp.lt.s32.totalorder %s843_s11, %s836_s12 }
  0x32   : > { %p840_p2 = pneg %p839_p1 }
  0x33   : > { %p846_p7 = por %p845_p6, %p844_p5 }
  0x35   : > { %p847_p10 = pnand %p846_p7, %p840_p2 }
  0x37   : > { %850 = shalt.err (!%p847_p10)
}
  0x38   : > { %725 = dma.hbm_to_vmem [thread:$0]  (!%p1105_p0), %s203_s24, 128, %s206_s26, %s194_s19  }
  0x39   : > { %s234_s23 = scalar_lea.vmem [#allocation7], %s1098_s6  ;;  %s997_s25 = smov [#allocation7]  }
  0x3a   : > { %s241_s5 = sshll.u32 %s234_s23, 4  ;;  %s869_s29 = sshll.u32 %s997_s25, 4  ;;  %s242_s5 = int_to_ptr.vmem [resolvable:$true] %s241_s5  ;;  %s870_s29 = int_to_ptr.vmem [resolvable:$false] %s869_s29 }
  0x3b   : > { %s864_s13 = scalar_lea.vmem %s242_s5, 128  ;;  %s871_s10 = scalar_lea.vmem %s870_s29, 256 }
  0x3c   : > { %p865_p13 = scmp.ne.s32.totalorder %s242_s5, %s864_s13  ;;  %p872_p2 = scmp.lt.s32.totalorder %s242_s5, %s870_s29 }
  0x3d   : > { %p873_p5 = scmp.lt.s32.totalorder %s871_s10, %s864_s13 }
  0x3e   : > { %p867_p12 = pnand %p865_p13, %p797_p3 }
  0x3f   : > { %p874_p6 = por %p873_p5, %p872_p2 }
  0x40   : > { %p868_p1 = pneg %p867_p12 }
  0x42   : > { %p875_p7 = pnand %p874_p6, %p868_p1 }
  0x44   : > { %878 = shalt.err (!%p875_p7)
}
  0x45   : > { %731 = dma.hbm_to_vmem [thread:$0]  (!%p1105_p0), %s239_s1, 128, %s242_s5, %s1117_s22  }
  0x46   : > { %250 = sbr.rel (%p1131_p4) target bundleno = 799 (0x31f), region = 32  ;;  %s1166_s24 = sand.u32 (!%p1131_p4), 1, %s977_s16  }
  0x47   : > { %s1169_s26 = sshll.u32 (!%p1131_p4), %s1166_s24, 3  ;;  %s253_s8 = scalar_lea.sflag (!%p1131_p4), [#allocation3], %s1166_s24 }
  0x48   : > { %s256_s12 = scalar_lea.vmem (!%p1131_p4), [#allocation2], %s1169_s26 }
  0x4b   : > { %956 = dma.done.wait (%p1078_p8), %s253_s8, 128  }
  0x4c   : > { %958 = vsyncadd (%p1078_p8), %s253_s8, 4294967168  ;;  %s261_s1 = sand.u32 1, %s1058_s21   ;;  %s265_s22 = scalar_lea.vmem [#allocation5], %s1169_s26 }
  0x4d   : > { %s262_s7 = scalar_lea.sflag [#allocation6], %s261_s1 }
  0x4e   : > { %960 = dma.done.wait (%p1078_p8), %s262_s7, 256  }
  0x4f   : > { %962 = vsyncadd (%p1078_p8), %s262_s7, 4294967040  ;;  %v998_v0 = vmov 0.0   ;;  %vm999_vm0 = vmmov 0   ;;  %vm317_vm1 = vcmask 130048   ;;  %v315_v1 = vld [vmem:[%s265_s22] sm:$0xff]  ;;  %v314_v2 = vld [vmem:[%s256_s12] sm:$0xff] }
  0x50   : > { %702 = vmatprep.subr.mxu0 %v998_v0  ;;  %704 = vmatprep.mubr.msk.f32.mxu0 %vm999_vm0, %v998_v0  ;;  %vm394_vm2 = vcmask 64512   ;;  %s274_s21 = scalar_lea.vmem [#allocation7], %s1169_s26  ;;  %s313_s27 = scalar_lea.vmem [#allocation9], %s1169_s26 }
  0x51   : > { %707 = vmatprep.subr.mxu1 %v998_v0  ;;  %709 = vmatprep.mubr.msk.f32.mxu1 %vm999_vm0, %v998_v0  ;;  %v316_v12 = vld [vmem:[%s274_s21] sm:$0xff]  ;;  %s694_s9 = sshll.u32 %s985_s18, 7  ;;  %s517_s5 = sshll.u32 %s313_s27, 4  ;;  %s518_s5 = int_to_ptr.vmem [resolvable:$true] %s517_s5 }
  0x52   : > { %703 = vmatpush3.xpose.msk.msra.mxu0 %vm317_vm1, %v315_v1  ;;  %708 = vmatpush3.msra.mxu1 %v316_v12  ;;  %s515_s23 = scalar_lea.hbm %s1269_s4, %s694_s9  ;;  %s489_s13 = scalar_lea.sflag [#allocation10], %s1166_s24 }
  0x53   : > { %s879_s25 = scalar_lea.vmem %s518_s5, 128  ;;  %s1000_s29 = smov [#allocation9]  }
  0x54   : > { %p880_p8 = scmp.ne.s32.totalorder %s518_s5, %s879_s25  ;;  %s883_s10 = sshll.u32 %s1000_s29, 4  ;;  %s884_s10 = int_to_ptr.vmem [resolvable:$false] %s883_s10 }
  0x55   : > { %705 = vmatmul.mubr.msk.f32.vlgmr.msra.gmra.mxu0 %vm317_vm1, %v314_v2  ;;  %s885_s19 = scalar_lea.vmem %s884_s10, 256  ;;  %p886_p4 = scmp.lt.s32.totalorder %s518_s5, %s884_s10 }
  0x56   : > { %p881_p0 = pnand %p880_p8, %p1082_p9  ;;  %p887_p10 = scmp.lt.s32.totalorder %s885_s19, %s879_s25 }
  0x58   : > { %p882_p3 = pneg %p881_p0  ;;  %p888_p13 = por %p887_p10, %p886_p4 }
  0x5a   : > { %p889_p12 = pnand %p888_p13, %p882_p3 }
 0x115   : > { %v390_v3 = vpop.f32.mrf.mxu0 }
 0x116   : > { %v395_v4 = vsel %vm394_vm2, %v390_v3, -inf }
 0x117   : > { %396 = vmax.xlane.f32.xlu0 %v395_v4  ;;  %v706_v5 = vpop.f32.mrf.mxu0 }
 0x1a0   : > { %v397_v6 = vpop.xlane.xlu0 %396 }
 0x1a1   : > { %v398_v7 = vsub.f32 %v390_v3, %v397_v6 }
 0x1a3   : > { %v399_v8 = vmul.f32 0.25, %v398_v7 }
 0x1a5   : > { %v400_v9 = vmul.f32 1.442695, %v399_v8 }
 0x1a7   : > { %791 = vpow2.f32 %v400_v9 }
 0x1b4   : > { %v792_v10 = vpop.eup %791 }
 0x1b5   : > { %v402_v11 = vsel %vm394_vm2, %v792_v10, 0.0 }
 0x1b6   : > { %403 = vadd.xlane.f32.xlu0 %v402_v11 }
 0x23f   : > { %v404_v13 = vpop.xlane.xlu0 %403 }
 0x240   : > { %793 = vrcp.f32 %v404_v13 }
 0x24d   : > { %v794_v14 = vpop.eup %793 }
 0x24e   : > { %v407_v15 = vmul.f32 %v794_v14, %v792_v10 }
 0x250   : > { %710 = vmatmul.mubr.msk.f32.vlgmr.msra.gmra.mxu1 %vm394_vm2, %v407_v15  ;;  %408 = vst.msk [vmem:[%s313_s27] sm:$0xff] %vm394_vm2, %v407_v15 }
 0x251   : > { %892 = shalt.err (!%p889_p12)
}
 0x252   : > { %s893_s6 = scalar_lea.hbm %s515_s23, 128  ;;  %s897_s1 = scalar_lea.hbm %s1269_s4, 256 }
 0x253   : > { %p894_p1 = scmp.ne.s32.totalorder %s515_s23, %s893_s6  ;;  %p898_p6 = scmp.lt.s32.totalorder %s515_s23, %s1269_s4 }
 0x254   : > { %p899_p7 = scmp.lt.s32.totalorder %s897_s1, %s893_s6 }
 0x255   : > { %p895_p2 = pnand %p894_p1, %p1082_p9 }
 0x256   : > { %p900_p8 = por %p899_p7, %p898_p6 }
 0x257   : > { %p896_p5 = pneg %p895_p2 }
 0x259   : > { %p901_p0 = pnand %p900_p8, %p896_p5 }
 0x25b   : > { %904 = shalt.err (!%p901_p0)
}
 0x25c   : > { %719 = dma.vmem_to_hbm [thread:$0]  (%p1082_p9), %s518_s5, 128, %s515_s23, %s489_s13  }
 0x25d   : > { %s306_s21 = scalar_lea.vmem [#allocation8], %s1169_s26  ;;  %s1216_s25 = scalar_lea.hbm %s1268_s3, %s694_s9 }
 0x25e   : > { %s503_s27 = sshll.u32 %s306_s21, 4  ;;  %s484_s29 = scalar_lea.sflag [#allocation4], %s1166_s24  ;;  %s1218_s27 = int_to_ptr.vmem [resolvable:$true] %s503_s27 }
 0x25f   : > { %s905_s10 = scalar_lea.vmem %s1218_s27, 128  ;;  %s1001_s18 = smov [#allocation8]  }
 0x260   : > { %p906_p3 = scmp.ne.s32.totalorder %s1218_s27, %s905_s10  ;;  %s909_s26 = sshll.u32 %s1001_s18, 4  ;;  %s910_s26 = int_to_ptr.vmem [resolvable:$false] %s909_s26 }
 0x261   : > { %s911_s9 = scalar_lea.vmem %s910_s26, 256  ;;  %p912_p13 = scmp.lt.s32.totalorder %s1218_s27, %s910_s26 }
 0x262   : > { %p907_p4 = pnand %p906_p3, %p1082_p9  ;;  %p913_p12 = scmp.lt.s32.totalorder %s911_s9, %s905_s10 }
 0x264   : > { %p908_p10 = pneg %p907_p4  ;;  %p914_p1 = por %p913_p12, %p912_p13 }
 0x266   : > { %p915_p2 = pnand %p914_p1, %p908_p10 }
 0x310   : > { %v478_v16 = vpop.f32.mrf.mxu1 }
 0x311   : > { %482 = vst.msk [vmem:[%s306_s21] sm:$0xff] %vm317_vm1, %v478_v16 }
 0x312   : > { %v711_v17 = vpop.f32.mrf.mxu1 }
 0x313   : > { %918 = shalt.err (!%p915_p2)
}
 0x314   : > { %s919_s23 = scalar_lea.hbm %s1216_s25, 128  ;;  %s923_s13 = scalar_lea.hbm %s1268_s3, 256 }
 0x315   : > { %p920_p5 = scmp.ne.s32.totalorder %s1216_s25, %s919_s23  ;;  %p924_p8 = scmp.lt.s32.totalorder %s1216_s25, %s1268_s3 }
 0x316   : > { %p925_p0 = scmp.lt.s32.totalorder %s923_s13, %s919_s23 }
 0x317   : > { %p921_p6 = pnand %p920_p5, %p1082_p9 }
 0x318   : > { %p926_p3 = por %p925_p0, %p924_p8 }
 0x319   : > { %p922_p7 = pneg %p921_p6 }
 0x31b   : > { %p927_p4 = pnand %p926_p3, %p922_p7 }
 0x31d   : > { %930 = shalt.err (!%p927_p4)
}
 0x31e   : > { %718 = dma.vmem_to_hbm [thread:$0]  (%p1082_p9), %s1218_s27, 128, %s1216_s25, %s484_s29  }
 0x31f PF: > { %s529_s8 = sand.u32 1, %s973_s15   ;;  %p1285_p10 = scmp.ge.s32.totalorder %s993_s20, 2 }
 0x320   : > { %s530_s12 = scalar_lea.sflag [#allocation4], %s529_s8 }
 0x321   : > { %p733_p13 = pnand %p1285_p10, %p1089_p11 }
 0x323   : > { %p734_p12 = pneg %p733_p13 }
 0x325   : > { %964 = dma.done.wait (%p734_p12), %s530_s12, 128  }
 0x326   : > { %966 = vsyncadd (%p734_p12), %s530_s12, 4294967168  ;;  %s539_s1 = scalar_lea.sflag [#allocation10], %s529_s8 }
 0x327   : > { %968 = dma.done.wait (%p734_p12), %s539_s1, 128  }
 0x328   : > { %970 = vsyncadd (%p734_p12), %s539_s1, 4294967168  ;;  %s27_s20 = sadd.s32 1, %s993_s20   ;;  %s1286_s28 = sld [smem:[#allocation17_spill]] }
 0x329   : > { %p24_p1 = scmp.ge.s32.totalorder %s27_s20, 4   ;;  %s1287_s18 = sld [smem:[#allocation15_spill]] }
 0x32a   : > { %s1288_s19 = sld [smem:[#allocation16_spill]]  ;;  %s1289_s15 = smov %s977_s16 }
 0x32b   : > { %s1290_s16 = smov %s981_s17  ;;  %26 = sbr.rel (!%p24_p1) target bundleno = 12 (0xc), region = 118 }
 0x32e   : > { %s1291_s17 = smov %s1286_s28 }
 0x330   :  { %544 = vsyncpa [#allocation3], 1 }
 0x331   :  { %546 = vsyncpa [#allocation3 + $0x1], 1 }
 0x332   :  { %547 = vsyncpa [#allocation6], 1 }
 0x333   :  { %549 = vsyncpa [#allocation6 + $0x1], 1 }
 0x334   :  { %550 = vsyncpa [#allocation4], 1 }
 0x335   :  { %552 = vsyncpa [#allocation4 + $0x1], 1 }
 0x336   :  { %553 = vsyncpa [#allocation10], 1 }
 0x337   :  { %555 = vsyncpa [#allocation10 + $0x1], 1 }

</bundles_post_ra>
